<compile_context>
chip_gen: v5e
topology: v5e:2x2
jax: 0.10.0
libtpu: 0.0.40
codegen_flags: <defaults>
</compile_context>

<pallas_src>
import math
from functools import partial

import jax
import jax.numpy as jnp
from jax import lax
from jax.experimental import pallas as pl
from jax.experimental.pallas import tpu as pltpu

_LANE = 128


def _round_up(v, m):
    return (v + m - 1) // m * m


def _choose_tiles(M, K, c_pad):
    """Pick (tm, tk) so the double-buffered working set stays well inside the default
    scoped-VMEM budget of every TPU generation (target ~10 MiB; v5e default is 16 MiB,
    v7x physical VMEM is 64 MiB)."""
    tk = K if K <= 1024 else 512
    tm = min(512, _round_up(M, 8))

    def footprint(tm_, tk_):
        # 2x double-buffered x / w / out blocks (+ scale & shift) + f32 accumulator scratch.
        return (2 * (tm_ * tk_ * 2 + tk_ * c_pad * 2 + tm_ * c_pad * 4)
                + tm_ * c_pad * 4 + 4 * c_pad * 4)

    while tm > 8 and footprint(tm, tk) > 10 * 1024 * 1024:
        tm = max(8, (tm // 2) // 8 * 8)
    return tm, tk


def _matmul_stats_kernel(x_ref, w_ref, sum_ref, sq_ref, acc_ref):
    """Pass 1: accumulate y = x @ w over the K grid axis; at the last K step emit this
    M-tile's per-channel sum and sum-of-squares (partial BatchNorm batch statistics)."""
    k = pl.program_id(1)

    @pl.when(k == 0)
    def _():
        acc_ref[...] = jnp.zeros_like(acc_ref)

    acc_ref[...] += jnp.dot(x_ref[...], w_ref[...], preferred_element_type=jnp.float32)

    @pl.when(k == pl.num_programs(1) - 1)
    def _():
        y = acc_ref[...]
        sum_ref[0] = jnp.sum(y, axis=0, keepdims=True)
        sq_ref[0] = jnp.sum(y * y, axis=0, keepdims=True)


def _matmul_bn_relu_kernel(x_ref, w_ref, scale_ref, shift_ref, o_ref, acc_ref, *, apply_relu):
    """Pass 2: recompute y = x @ w and apply the folded BatchNorm affine (+ ReLU)."""
    k = pl.program_id(1)

    @pl.when(k == 0)
    def _():
        acc_ref[...] = jnp.zeros_like(acc_ref)

    acc_ref[...] += jnp.dot(x_ref[...], w_ref[...], preferred_element_type=jnp.float32)

    @pl.when(k == pl.num_programs(1) - 1)
    def _():
        y = acc_ref[...] * scale_ref[...] + shift_ref[...]
        if apply_relu:
            y = jnp.maximum(y, 0.0)
        o_ref[...] = y


def _conv_bn_relu_2d(x2d, w2d, gamma, beta, *, eps, apply_relu):
    """(M, K) @ (K, Cout), training-mode BatchNorm over rows, optional ReLU -> (M, Cout) f32."""
    M, K = x2d.shape
    Cout = w2d.shape[-1]
    c_pad = _round_up(Cout, _LANE)
    tm, tk = _choose_tiles(M, K, c_pad)
    m_pad = _round_up(M, tm)
    k_pad = _round_up(K, tk)
    nm, nk = m_pad // tm, k_pad // tk

    # bf16 operand streams; zero padding keeps the matmul exact, the padded rows contribute
    # nothing to the batch statistics (no bias is added), and the padded MXU N columns are free.
    xb = jnp.pad(x2d.astype(jnp.bfloat16), ((0, m_pad - M), (0, k_pad - K)))
    wb = jnp.pad(w2d.astype(jnp.bfloat16), ((0, k_pad - K), (0, c_pad - Cout)))

    # ---------------- pass 1: per-M-tile partial channel statistics ----------------
    sums, sqs = pl.pallas_call(
        _matmul_stats_kernel,
        out_shape=(
            jax.ShapeDtypeStruct((nm, 1, c_pad), jnp.float32),
            jax.ShapeDtypeStruct((nm, 1, c_pad), jnp.float32),
        ),
        grid=(nm, nk),
        in_specs=[
            pl.BlockSpec((tm, tk), lambda m, k: (m, k)),
            pl.BlockSpec((tk, c_pad), lambda m, k: (k, 0)),
        ],
        out_specs=(
            pl.BlockSpec((1, 1, c_pad), lambda m, k: (m, 0, 0)),
            pl.BlockSpec((1, 1, c_pad), lambda m, k: (m, 0, 0)),
        ),
        scratch_shapes=[pltpu.VMEM((tm, c_pad), jnp.float32)],
        compiler_params=pltpu.CompilerParams(
            dimension_semantics=("parallel", "arbitrary")),
    )(xb, wb)

    # -------- tiny JAX glue: reduce partials, fold BN into per-channel scale/shift --------
    total = jnp.sum(sums, axis=0)          # (1, c_pad)
    total_sq = jnp.sum(sqs, axis=0)        # (1, c_pad)
    mean = total / M
    var = jnp.maximum(total_sq / M - mean * mean, 0.0)   # biased variance, clamped
    g_pad = jnp.pad(gamma.reshape(1, Cout).astype(jnp.float32), ((0, 0), (0, c_pad - Cout)))
    b_pad = jnp.pad(beta.reshape(1, Cout).astype(jnp.float32), ((0, 0), (0, c_pad - Cout)))
    scale = g_pad * lax.rsqrt(var + eps)
    shift = b_pad - mean * scale

    # ------- pass 2: recompute matmul, apply affine + ReLU, single lane-dense write -------
    out = pl.pallas_call(
        partial(_matmul_bn_relu_kernel, apply_relu=apply_relu),
        out_shape=jax.ShapeDtypeStruct((m_pad, c_pad), jnp.float32),
        grid=(nm, nk),
        in_specs=[
            pl.BlockSpec((tm, tk), lambda m, k: (m, k)),
            pl.BlockSpec((tk, c_pad), lambda m, k: (k, 0)),
            pl.BlockSpec((1, c_pad), lambda m, k: (0, 0)),
            pl.BlockSpec((1, c_pad), lambda m, k: (0, 0)),
        ],
        out_specs=pl.BlockSpec((tm, c_pad), lambda m, k: (m, 0)),
        scratch_shapes=[pltpu.VMEM((tm, c_pad), jnp.float32)],
        compiler_params=pltpu.CompilerParams(
            dimension_semantics=("parallel", "arbitrary")),
    )(xb, wb, scale, shift)

    return out[:M, :Cout]


def conv2d_forward(x, weight, bias, gamma, beta, *, kernel_size, stride=(1, 1),
                   padding='VALID', eps=1e-5, activation=True):
    """x: (B, W, H, Cin); weight: (kh, kw, Cin, Cout). Returns (B, Wo, Ho, Cout).

    `bias` is accepted for interface parity but not applied: the conv bias is exactly
    canceled by the training-mode BatchNorm that always follows it in this module
    (it shifts the batch mean and leaves the variance unchanged)."""
    del bias
    kh, kw = kernel_size
    sh, sw = stride
    if padding == 'SAME':
        # TODO(synk): the reference 'SAME' branch (math.ceil(kernel_size) on a tuple) crashes
        # F.pad in the original module; only the working 'VALID' path is reproduced.
        raise NotImplementedError("Only padding='VALID' is supported (see TODO).")
    Cout = weight.shape[-1]

    if (kh, kw) == (1, 1) and (sh, sw) == (1, 1):
        # Pointwise conv (the GMAN "FC" use): the module's input and output permutes cancel
        # and im2col is a free reshape -- no transposes are materialized.
        B, W, H, Cin = x.shape
        out2d = _conv_bn_relu_2d(x.reshape(B * W * H, Cin), weight.reshape(Cin, Cout),
                                 gamma, beta, eps=eps, apply_relu=activation)
        return out2d.reshape(B, W, H, Cout)

    # General kh x kw path: JAX-side im2col, channels-last lane-dense rows.
    # TODO(synk): for kh*kw > 1 the taps could instead be reduced inside the kernel via a grid
    # axis over the (i, j) window shifts, reading x once instead of kh*kw times.
    x_nhwc = jnp.transpose(x, (0, 2, 1, 3))            # (B, H, W, Cin)
    B, H, W, Cin = x_nhwc.shape
    Ho = (H - kh) // sh + 1
    Wo = (W - kw) // sw + 1
    patches = jnp.stack(
        [x_nhwc[:, i:i + sh * (Ho - 1) + 1:sh, j:j + sw * (Wo - 1) + 1:sw, :]
         for i in range(kh) for j in range(kw)],
        axis=3,
    )                                                  # (B, Ho, Wo, kh*kw, Cin)
    x2d = patches.reshape(B * Ho * Wo, kh * kw * Cin)
    w2d = weight.reshape(kh * kw * Cin, Cout)
    out2d = _conv_bn_relu_2d(x2d, w2d, gamma, beta, eps=eps, apply_relu=activation)
    out = out2d.reshape(B, Ho, Wo, Cout)
    # matches the final torch permute(0, 3, 2, 1) on the NCHW conv output
    return jnp.transpose(out, (0, 2, 1, 3))            # (B, Wo, Ho, Cout)


if __name__ == "__main__":
    key = jax.random.PRNGKey(0)
    # GMAN uses conv2d_ as a 1x1 conv ("FC") with padding='VALID', stride=(1,1).
    B, W, H, Cin, Cout = 2, 8, 16, 4, 16
    k_x, k_w = jax.random.split(key)
    x = jax.random.normal(k_x, (B, W, H, Cin), dtype=jnp.float32)

    # Deterministic parameter init matching the module's __init__:
    # xavier_uniform conv weight, zero conv bias, BatchNorm gamma=1 / beta=0.
    limit = math.sqrt(6.0 / (Cin + Cout))
    weight = jax.random.uniform(k_w, (1, 1, Cin, Cout), jnp.float32, -limit, limit)
    bias = jnp.zeros((Cout,), jnp.float32)
    gamma = jnp.ones((Cout,), jnp.float32)
    beta = jnp.zeros((Cout,), jnp.float32)

    out = conv2d_forward(x, weight, bias, gamma, beta, kernel_size=(1, 1),
                         stride=(1, 1), padding='VALID', activation=True)
    out = jax.block_until_ready(out)
    assert out.shape == (B, W, H, Cout), out.shape

    # Pure-JAX reference (f32 math on the same bf16-rounded operands the kernel streams).
    xr = x.astype(jnp.bfloat16).astype(jnp.float32)
    wr = weight.reshape(Cin, Cout).astype(jnp.bfloat16).astype(jnp.float32)
    x_nhwc = jnp.transpose(xr, (0, 2, 1, 3))
    y_ref = jnp.einsum('bhwc,co->bhwo', x_nhwc, wr)
    mean = y_ref.mean(axis=(0, 1, 2))
    var = y_ref.var(axis=(0, 1, 2))
    ref = jnp.maximum((y_ref - mean) / jnp.sqrt(var + 1e-5) * gamma + beta, 0.0)
    ref = jnp.transpose(ref, (0, 2, 1, 3))
    assert jnp.allclose(out, ref, atol=2e-3, rtol=2e-3), float(jnp.max(jnp.abs(out - ref)))

    # Also exercise the general (kh, kw) > 1 path: 2x2 VALID conv + BN + ReLU.
    w2 = jax.random.uniform(jax.random.PRNGKey(1), (2, 2, Cin, Cout), jnp.float32, -limit, limit)
    out2 = conv2d_forward(x, w2, bias, gamma, beta, kernel_size=(2, 2),
                          stride=(1, 1), padding='VALID', activation=True)
    out2 = jax.block_until_ready(out2)
    x_nhwc2 = jnp.transpose(x.astype(jnp.bfloat16).astype(jnp.float32), (0, 2, 1, 3))
    y2 = lax.conv_general_dilated(x_nhwc2, w2.astype(jnp.bfloat16).astype(jnp.float32),
                                  window_strides=(1, 1), padding='VALID',
                                  dimension_numbers=('NHWC', 'HWIO', 'NHWC'))
    m2 = y2.mean(axis=(0, 1, 2))
    v2 = y2.var(axis=(0, 1, 2))
    ref2 = jnp.maximum((y2 - m2) / jnp.sqrt(v2 + 1e-5) * gamma + beta, 0.0)
    ref2 = jnp.transpose(ref2, (0, 2, 1, 3))
    assert out2.shape == ref2.shape, (out2.shape, ref2.shape)
    assert jnp.allclose(out2, ref2, atol=2e-3, rtol=2e-3), float(jnp.max(jnp.abs(out2 - ref2)))

    print("KERNEL_OK")
</pallas_src>

<mosaic_0001>
module attributes {stable_mosaic.version = 11 : i64} {
  func.func @_matmul_stats_kernel(%arg0: i32, %arg1: i32, %arg2: memref<256x4xbf16, #tpu.memory_space<vmem>>, %arg3: memref<4x128xbf16, #tpu.memory_space<vmem>>, %arg4: memref<1x1x128xf32, #tpu.memory_space<vmem>>, %arg5: memref<1x1x128xf32, #tpu.memory_space<vmem>>, %arg6: memref<256x128xf32, #tpu.memory_space<vmem>>) attributes {dimension_semantics = [#tpu.dimension_semantics<parallel>, #tpu.dimension_semantics<arbitrary>], iteration_bounds = array<i64: 1, 1>, scalar_prefetch = 0 : i64, scratch_operands = 1 : i64, tpu.core_type = #tpu.core_type<tc>, window_params = [{transform_indices = @transform_0, window_bounds = array<i64: 256, 4>}, {transform_indices = @transform_1, window_bounds = array<i64: 4, 128>}, {transform_indices = @transform_2, window_bounds = array<i64: 1, 1, 128>}, {transform_indices = @transform_3, window_bounds = array<i64: 1, 1, 128>}]} {
    %c0_i32 = arith.constant 0 : i32
    %0 = arith.cmpi eq, %arg1, %c0_i32 : i32
    %1 = arith.extui %0 : i1 to i32
    %c0_i32_0 = arith.constant 0 : i32
    %2 = arith.cmpi ne, %1, %c0_i32_0 : i32
    scf.if %2 {
      %cst_10 = arith.constant 0.000000e+00 : f32
      %12 = vector.broadcast %cst_10 : f32 to vector<256x128xf32>
      %c0_11 = arith.constant 0 : index
      %c0_12 = arith.constant 0 : index
      %13 = vector.load %arg6[%c0_11, %c0_12] : memref<256x128xf32, #tpu.memory_space<vmem>>, vector<256x128xf32>
      tpu.vector_store %arg6[%c0_11, %c0_12], %12 {strides = array<i32>} : memref<256x128xf32, #tpu.memory_space<vmem>>, vector<256x128xf32>,
    } else {
    }
    %c0 = arith.constant 0 : index
    %c0_1 = arith.constant 0 : index
    %3 = vector.load %arg6[%c0, %c0_1] : memref<256x128xf32, #tpu.memory_space<vmem>>, vector<256x128xf32>
    %c0_2 = arith.constant 0 : index
    %c0_3 = arith.constant 0 : index
    %4 = vector.load %arg2[%c0_2, %c0_3] : memref<256x4xbf16, #tpu.memory_space<vmem>>, vector<256x4xbf16>
    %c0_4 = arith.constant 0 : index
    %c0_5 = arith.constant 0 : index
    %5 = vector.load %arg3[%c0_4, %c0_5] : memref<4x128xbf16, #tpu.memory_space<vmem>>, vector<4x128xbf16>
    %cst = arith.constant dense<0.000000e+00> : vector<256x128xf32>
    %6 = tpu.matmul %4, %5, %cst {dimension_numbers = #tpu.dot_dimension_numbers<[1], [0], [0], [1], [0, 0, 1, 1], [], []>} : vector<256x4xbf16>, vector<4x128xbf16>, vector<256x128xf32> -> vector<256x128xf32>
    %7 = arith.addf %3, %6 : vector<256x128xf32>
    %c0_6 = arith.constant 0 : index
    %c0_7 = arith.constant 0 : index
    %8 = vector.load %arg6[%c0_6, %c0_7] : memref<256x128xf32, #tpu.memory_space<vmem>>, vector<256x128xf32>
    tpu.vector_store %arg6[%c0_6, %c0_7], %7 {strides = array<i32>} : memref<256x128xf32, #tpu.memory_space<vmem>>, vector<256x128xf32>,
    %c0_i32_8 = arith.constant 0 : i32
    %9 = arith.cmpi eq, %arg1, %c0_i32_8 : i32
    %10 = arith.extui %9 : i1 to i32
    %c0_i32_9 = arith.constant 0 : i32
    %11 = arith.cmpi ne, %10, %c0_i32_9 : i32
    scf.if %11 {
      %c0_10 = arith.constant 0 : index
      %c0_11 = arith.constant 0 : index
      %12 = vector.load %arg6[%c0_10, %c0_11] : memref<256x128xf32, #tpu.memory_space<vmem>>, vector<256x128xf32>
      %cst_12 = arith.constant dense<0.000000e+00> : vector<128xf32>
      %13 = vector.multi_reduction <add>, %12, %cst_12 [0] : vector<256x128xf32> to vector<128xf32>
      %14 = vector.shape_cast %13 : vector<128xf32> to vector<1x128xf32>
      %c0_13 = arith.constant 0 : index
      %c0_14 = arith.constant 0 : index
      %c0_15 = arith.constant 0 : index
      %15 = vector.load %arg4[%c0_13, %c0_14, %c0_15] : memref<1x1x128xf32, #tpu.memory_space<vmem>>, vector<1x1x128xf32>
      %16 = vector.shape_cast %15 : vector<1x1x128xf32> to vector<1x128xf32>
      %17 = vector.shape_cast %14 : vector<1x128xf32> to vector<1x1x128xf32>
      tpu.vector_store %arg4[%c0_13, %c0_14, %c0_15], %17 {strides = array<i32>} : memref<1x1x128xf32, #tpu.memory_space<vmem>>, vector<1x1x128xf32>,
      %18 = arith.mulf %12, %12 : vector<256x128xf32>
      %cst_16 = arith.constant dense<0.000000e+00> : vector<128xf32>
      %19 = vector.multi_reduction <add>, %18, %cst_16 [0] : vector<256x128xf32> to vector<128xf32>
      %20 = vector.shape_cast %19 : vector<128xf32> to vector<1x128xf32>
      %c0_17 = arith.constant 0 : index
      %c0_18 = arith.constant 0 : index
      %c0_19 = arith.constant 0 : index
      %21 = vector.load %arg5[%c0_17, %c0_18, %c0_19] : memref<1x1x128xf32, #tpu.memory_space<vmem>>, vector<1x1x128xf32>
      %22 = vector.shape_cast %21 : vector<1x1x128xf32> to vector<1x128xf32>
      %23 = vector.shape_cast %20 : vector<1x128xf32> to vector<1x1x128xf32>
      tpu.vector_store %arg5[%c0_17, %c0_18, %c0_19], %23 {strides = array<i32>} : memref<1x1x128xf32, #tpu.memory_space<vmem>>, vector<1x1x128xf32>,
    } else {
    }
    return
  }
  func.func @transform_0(%arg0: i32, %arg1: i32) -> (i32, i32) {
    %c0_i32 = arith.constant 0 : i32
    return %arg0, %arg1 : i32, i32
  }
  func.func @transform_1(%arg0: i32, %arg1: i32) -> (i32, i32) {
    %c0_i32 = arith.constant 0 : i32
    %c0_i32_0 = arith.constant 0 : i32
    return %arg1, %c0_i32 : i32, i32
  }
  func.func @transform_2(%arg0: i32, %arg1: i32) -> (i32, i32, i32) {
    %c0_i32 = arith.constant 0 : i32
    %c0_i32_0 = arith.constant 0 : i32
    %c0_i32_1 = arith.constant 0 : i32
    return %arg0, %c0_i32, %c0_i32_0 : i32, i32, i32
  }
  func.func @transform_3(%arg0: i32, %arg1: i32) -> (i32, i32, i32) {
    %c0_i32 = arith.constant 0 : i32
    %c0_i32_0 = arith.constant 0 : i32
    %c0_i32_1 = arith.constant 0 : i32
    return %arg0, %c0_i32, %c0_i32_0 : i32, i32, i32
  }
}

</mosaic_0001>

<bundles_post_ra>
// kernel: tpu_custom_call.1
= control target key start
LH: loop header
LB: loop body
LE: loop exit
PB: predicated region body
PF: predicated region fallthrough
CT: control target
= control target key end

     0   :  { %9 = vsyncpa [#allocation4], 0  ;;  %vm246_vm0 = vcmask 1041408   ;;  %vm197_vm1 = vcmask 31744   ;;  %s861_s0 = inlined_call_operand.vmem [shape: bf16[256,4], index: 0, kind: input, shape index: {}]   ;;  %s862_s1 = inlined_call_operand.vmem [shape: bf16[4,128], index: 1, kind: input, shape index: {}]   ;;  %s863_s2 = inlined_call_operand.hbm [shape: f32[1,1,128], index: 2, kind: output, shape index: {0}]   ;;  %s864_s3 = inlined_call_operand.hbm [shape: f32[1,1,128], index: 3, kind: output, shape index: {1}]  }
   0x1   :  { %v116_v0 = vld [vmem:[%s862_s1] sm:$0x3] }
   0x2   :  { %v248_v1 = vsel %vm246_vm0, %v116_v0, 0  ;;  %v658_v2 = vld [vmem:[%s861_s0] sm:$0xff] }
   0x3   :  { %v662_v3 = vld [vmem:[%s861_s0 + $0x20] sm:$0xff]  ;;  %257 = vmatpush.bf16.msra.mxu0 %v248_v1  ;;  %674 = vmatpush.bf16.msra.mxu1 %v248_v1 }
   0x4   :  { %v666_v4 = vld [vmem:[%s861_s0 + $0x40] sm:$0xff] }
   0x5   :  { %10 = vsyncpa [#allocation6], 0  ;;  %675 = vmatpush.bf16.msra.mxu2 %v248_v1  ;;  %676 = vmatpush.bf16.msra.mxu3 %v248_v1  ;;  %v670_v5 = vld [vmem:[%s861_s0 + $0x60] sm:$0xff]  ;;  %v659_v6 = vld [vmem:[%s861_s0 + $0x8] sm:$0xff]  ;;  %s553_s20 = sshll.u32 %s863_s2, 4  ;;  %s732_s21 = smov [#allocation5]   ;;  %s554_s20 = int_to_ptr.hbm [resolvable:$true] %s553_s20 }
   0x6   :  { %642 = vmatmul.msk.bf16.vlgmr.msra.gmra.mxu0 %vm197_vm1, %v658_v2  ;;  %646 = vmatmul.msk.bf16.vlgmr.msra.gmra.mxu1 %vm197_vm1, %v662_v3  ;;  %v663_v7 = vld [vmem:[%s861_s0 + $0x28] sm:$0xff]  ;;  %v660_v10 = vld [vmem:[%s861_s0 + $0x10] sm:$0xff]  ;;  %v661_v14 = vld [vmem:[%s861_s0 + $0x18] sm:$0xff]  ;;  %s562_s22 = sshll.u32 %s732_s21, 4  ;;  %s564_s25 = sshll.u32 %s864_s3, 4  ;;  %s563_s22 = int_to_ptr.vmem [resolvable:$true] %s562_s22  ;;  %s565_s25 = int_to_ptr.hbm [resolvable:$true] %s564_s25 }
   0x7   :  { %v667_v8 = vld [vmem:[%s861_s0 + $0x48] sm:$0xff]  ;;  %v664_v11 = vld [vmem:[%s861_s0 + $0x30] sm:$0xff]  ;;  %v665_v15 = vld [vmem:[%s861_s0 + $0x38] sm:$0xff] }
   0x8   :  { %650 = vmatmul.msk.bf16.vlgmr.msra.gmra.mxu2 %vm197_vm1, %v666_v4  ;;  %654 = vmatmul.msk.bf16.vlgmr.msra.gmra.mxu3 %vm197_vm1, %v670_v5  ;;  %v671_v9 = vld [vmem:[%s861_s0 + $0x68] sm:$0xff]  ;;  %v668_v12 = vld [vmem:[%s861_s0 + $0x50] sm:$0xff]  ;;  %v669_v16 = vld [vmem:[%s861_s0 + $0x58] sm:$0xff] }
   0x9   :  { %v672_v13 = vld [vmem:[%s861_s0 + $0x70] sm:$0xff]  ;;  %v673_v17 = vld [vmem:[%s861_s0 + $0x78] sm:$0xff]  ;;  %s731_s0 = smov [#allocation3]  }
   0xa   :  { %s551_s18 = sshll.u32 %s731_s0, 4  ;;  %s552_s18 = int_to_ptr.vmem [resolvable:$true] %s551_s18 }
  0x16   :  { %643 = vmatmul.msk.bf16.gmra.mxu0 %vm197_vm1, %v659_v6  ;;  %647 = vmatmul.msk.bf16.gmra.mxu1 %vm197_vm1, %v663_v7 }
  0x18   :  { %651 = vmatmul.msk.bf16.gmra.mxu2 %vm197_vm1, %v667_v8  ;;  %655 = vmatmul.msk.bf16.gmra.mxu3 %vm197_vm1, %v671_v9 }
  0x26   :  { %644 = vmatmul.msk.bf16.gmra.mxu0 %vm197_vm1, %v660_v10  ;;  %648 = vmatmul.msk.bf16.gmra.mxu1 %vm197_vm1, %v664_v11 }
  0x28   :  { %652 = vmatmul.msk.bf16.gmra.mxu2 %vm197_vm1, %v668_v12  ;;  %656 = vmatmul.msk.bf16.gmra.mxu3 %vm197_vm1, %v672_v13 }
  0x36   :  { %645 = vmatmul.msk.bf16.gmra.mxu0 %vm197_vm1, %v661_v14  ;;  %649 = vmatmul.msk.bf16.gmra.mxu1 %vm197_vm1, %v665_v15 }
  0x38   :  { %653 = vmatmul.msk.bf16.gmra.mxu2 %vm197_vm1, %v669_v16  ;;  %657 = vmatmul.msk.bf16.gmra.mxu3 %vm197_vm1, %v673_v17 }
  0x83   :  { %v259_v18 = vpop.f32.mrf.mxu0  ;;  %v279_v19 = vpop.f32.mrf.mxu1 }
  0x84   :  { %v476_v35 = vmul.f32 %v259_v18, %v259_v18  ;;  %v484_v61 = vmul.f32 %v279_v19, %v279_v19 }
  0x8b   :  { %v261_v20 = vpop.f32.mrf.mxu0  ;;  %v281_v21 = vpop.f32.mrf.mxu1 }
  0x8c   :  { %v820_v23 = vpop.f32.mrf.mxu2  ;;  %v824_v29 = vpop.f32.mrf.mxu3  ;;  %v477_v34 = vmul.f32 %v261_v20, %v261_v20  ;;  %v438_v36 = vadd.f32 %v261_v20, %v259_v18  ;;  %v485_v1 = vmul.f32 %v281_v21, %v281_v21 }
  0x8e   :  { %v508_v39 = vadd.f32 %v477_v34, %v476_v35 }
  0x93   :  { %v264_v22 = vpop.f32.mrf.mxu0  ;;  %v284_v24 = vpop.f32.mrf.mxu1 }
  0x94   :  { %v822_v26 = vpop.f32.mrf.mxu2  ;;  %v828_v33 = vpop.f32.mrf.mxu3  ;;  %v478_v37 = vmul.f32 %v264_v22, %v264_v22  ;;  %v439_v40 = vadd.f32 %v438_v36, %v264_v22  ;;  %v486_v5 = vmul.f32 %v284_v24, %v284_v24 }
  0x96   :  { %v509_v43 = vadd.f32 %v508_v39, %v478_v37 }
  0x9b   :  { %v266_v25 = vpop.f32.mrf.mxu0  ;;  %v286_v27 = vpop.f32.mrf.mxu1 }
  0x9c   :  { %v826_v30 = vpop.f32.mrf.mxu2  ;;  %v479_v41 = vmul.f32 %v266_v25, %v266_v25  ;;  %v440_v44 = vadd.f32 %v439_v40, %v266_v25  ;;  %v832_v50 = vpop.f32.mrf.mxu3  ;;  %v487_v8 = vmul.f32 %v286_v27, %v286_v27 }
  0x9d   :  { %v494_v39 = vmul.f32 %v826_v30, %v826_v30 }
  0x9e   :  { %v510_v47 = vadd.f32 %v509_v43, %v479_v41 }
  0xa3   :  { %v269_v28 = vpop.f32.mrf.mxu0  ;;  %v289_v32 = vpop.f32.mrf.mxu1 }
  0xa4   :  { %v830_v38 = vpop.f32.mrf.mxu2  ;;  %v480_v45 = vmul.f32 %v269_v28, %v269_v28  ;;  %v441_v48 = vadd.f32 %v440_v44, %v269_v28  ;;  %v326_v4 = vpop.f32.mrf.mxu3  ;;  %v488_v12 = vmul.f32 %v289_v32, %v289_v32 }
  0xa6   :  { %v511_v51 = vadd.f32 %v510_v47, %v480_v45 }
  0xab   :  { %v271_v31 = vpop.f32.mrf.mxu0  ;;  %v291_v46 = vpop.f32.mrf.mxu1 }
  0xac   :  { %v481_v49 = vmul.f32 %v271_v31, %v271_v31  ;;  %v442_v52 = vadd.f32 %v441_v48, %v271_v31  ;;  %v309_v57 = vpop.f32.mrf.mxu2  ;;  %v489_v15 = vmul.f32 %v291_v46, %v291_v46 }
  0xad   :  { %v496_v45 = vmul.f32 %v309_v57, %v309_v57 }
  0xae   :  { %v512_v54 = vadd.f32 %v511_v51, %v481_v49 }
  0xb3   :  { %v274_v42 = vpop.f32.mrf.mxu0  ;;  %v294_v0 = vpop.f32.mrf.mxu1 }
  0xb4   :  { %v482_v53 = vmul.f32 %v274_v42, %v274_v42  ;;  %v443_v55 = vadd.f32 %v442_v52, %v274_v42  ;;  %v311_v11 = vpop.f32.mrf.mxu2  ;;  %v490_v20 = vmul.f32 %v294_v0, %v294_v0  ;;  %v495_v42 = vmul.f32 %v830_v38, %v830_v38 }
  0xb5   :  { %v497_v49 = vmul.f32 %v311_v11, %v311_v11 }
  0xb6   :  { %v513_v58 = vadd.f32 %v512_v54, %v482_v53 }
  0xbb   :  { %v276_v56 = vpop.f32.mrf.mxu0  ;;  %v296_v18 = vpop.f32.mrf.mxu1 }
  0xbc   :  { %v444_v59 = vadd.f32 %v443_v55, %v276_v56  ;;  %v483_v60 = vmul.f32 %v276_v56, %v276_v56  ;;  %v491_v31 = vmul.f32 %v296_v18, %v296_v18  ;;  %v314_v35 = vpop.f32.mrf.mxu2 }
  0xbd   :  { %v498_v54 = vmul.f32 %v314_v35, %v314_v35 }
  0xbe   :  { %v445_v62 = vadd.f32 %v444_v59, %v279_v19  ;;  %v514_v63 = vadd.f32 %v513_v58, %v483_v60  ;;  %v500_v58 = vmul.f32 %v824_v29, %v824_v29 }
  0xc0   :  { %v446_v2 = vadd.f32 %v445_v62, %v281_v21  ;;  %v515_v3 = vadd.f32 %v514_v63, %v484_v61  ;;  %v329_v21 = vpop.f32.mrf.mxu3  ;;  %v502_v63 = vmul.f32 %v832_v50, %v832_v50 }
  0xc2   :  { %v447_v6 = vadd.f32 %v446_v2, %v284_v24  ;;  %v516_v7 = vadd.f32 %v515_v3, %v485_v1  ;;  %v492_v24 = vmul.f32 %v820_v23, %v820_v23  ;;  %v503_v2 = vmul.f32 %v326_v4, %v326_v4 }
  0xc4   :  { %v517_v9 = vadd.f32 %v516_v7, %v486_v5  ;;  %v448_v10 = vadd.f32 %v447_v6, %v286_v27  ;;  %v316_v51 = vpop.f32.mrf.mxu2  ;;  %v504_v6 = vmul.f32 %v329_v21, %v329_v21 }
  0xc5   :  { %v499_v56 = vmul.f32 %v316_v51, %v316_v51 }
  0xc6   :  { %v449_v13 = vadd.f32 %v448_v10, %v289_v32  ;;  %v518_v14 = vadd.f32 %v517_v9, %v487_v8  ;;  %v493_v32 = vmul.f32 %v822_v26, %v822_v26 }
  0xc8   :  { %v450_v16 = vadd.f32 %v449_v13, %v291_v46  ;;  %v519_v17 = vadd.f32 %v518_v14, %v488_v12  ;;  %v331_v44 = vpop.f32.mrf.mxu3 }
  0xc9   :  { %v505_v9 = vmul.f32 %v331_v44, %v331_v44 }
  0xca   :  { %v451_v19 = vadd.f32 %v450_v16, %v294_v0  ;;  %v520_v22 = vadd.f32 %v519_v17, %v489_v15 }
  0xcc   :  { %v521_v25 = vadd.f32 %v520_v22, %v490_v20  ;;  %v452_v28 = vadd.f32 %v451_v19, %v296_v18 }
  0xce   :  { %v453_v27 = vadd.f32 %v452_v28, %v820_v23  ;;  %v522_v34 = vadd.f32 %v521_v25, %v491_v31 }
  0xd0   :  { %v454_v36 = vadd.f32 %v453_v27, %v822_v26  ;;  %v523_v37 = vadd.f32 %v522_v34, %v492_v24  ;;  %v334_v60 = vpop.f32.mrf.mxu3 }
  0xd2   :  { %v455_v40 = vadd.f32 %v454_v36, %v826_v30  ;;  %v524_v41 = vadd.f32 %v523_v37, %v493_v32 }
  0xd4   :  { %v525_v43 = vadd.f32 %v524_v41, %v494_v39  ;;  %v456_v23 = vadd.f32 %v455_v40, %v830_v38 }
  0xd6   :  { %v457_v46 = vadd.f32 %v456_v23, %v309_v57  ;;  %v526_v47 = vadd.f32 %v525_v43, %v495_v42  ;;  %v501_v57 = vmul.f32 %v828_v33, %v828_v33 }
  0xd8   :  { %v458_v48 = vadd.f32 %v457_v46, %v311_v11  ;;  %v527_v26 = vadd.f32 %v526_v47, %v496_v45  ;;  %v336_v11 = vpop.f32.mrf.mxu3 }
  0xd9   :  { %v507_v16 = vmul.f32 %v336_v11, %v336_v11 }
  0xda   :  { %v528_v52 = vadd.f32 %v527_v26, %v497_v49  ;;  %v459_v53 = vadd.f32 %v458_v48, %v314_v35 }
  0xdc   :  { %v529_v55 = vadd.f32 %v528_v52, %v498_v54  ;;  %v460_v30 = vadd.f32 %v459_v53, %v316_v51 }
  0xde   :  { %v461_v59 = vadd.f32 %v460_v30, %v824_v29  ;;  %v530_v38 = vadd.f32 %v529_v55, %v499_v56 }
  0xe0   :  { %v462_v61 = vadd.f32 %v461_v59, %v828_v33  ;;  %v531_v62 = vadd.f32 %v530_v38, %v500_v58  ;;  %v506_v33 = vmul.f32 %v334_v60, %v334_v60 }
  0xe2   :  { %v463_v0 = vadd.f32 %v462_v61, %v832_v50  ;;  %v532_v1 = vadd.f32 %v531_v62, %v501_v57 }
  0xe4   :  { %v533_v3 = vadd.f32 %v532_v1, %v502_v63  ;;  %v464_v5 = vadd.f32 %v463_v0, %v326_v4 }
  0xe6   :  { %v465_v7 = vadd.f32 %v464_v5, %v329_v21  ;;  %v534_v29 = vadd.f32 %v533_v3, %v503_v2 }
  0xe8   :  { %v466_v8 = vadd.f32 %v465_v7, %v331_v44  ;;  %v535_v10 = vadd.f32 %v534_v29, %v504_v6 }
  0xea   :  { %v536_v12 = vadd.f32 %v535_v10, %v505_v9  ;;  %v467_v13 = vadd.f32 %v466_v8, %v334_v60 }
  0xec   :  { %v537_v14 = vadd.f32 %v536_v12, %v506_v33  ;;  %v468_v15 = vadd.f32 %v467_v13, %v336_v11 }
  0xee   :  { %v469_v17 = vrot.slane %v468_v15, 4  ;;  %v538_v18 = vadd.f32 %v537_v14, %v507_v16 }
  0xf0   :  { %v470_v50 = vadd.f32 %v469_v17, %v468_v15  ;;  %v539_v19 = vrot.slane %v538_v18, 4 }
  0xf2   :  { %v471_v20 = vrot.slane %v470_v50, 2  ;;  %v540_v22 = vadd.f32 %v539_v19, %v538_v18 }
  0xf4   :  { %v541_v4 = vrot.slane %v540_v22, 2  ;;  %v472_v25 = vadd.f32 %v471_v20, %v470_v50 }
  0xf6   :  { %v473_v21 = vrot.slane %v472_v25, 1  ;;  %v542_v28 = vadd.f32 %v541_v4, %v540_v22 }
  0xf8   :  { %v474_v31 = vadd.f32 %v473_v21, %v472_v25  ;;  %v543_v24 = vrot.slane %v542_v28, 1 }
  0xfa   :  { %475 = vst [vmem:[#allocation3] sm:$0x1] %v474_v31  ;;  %v544_v27 = vadd.f32 %v543_v24, %v542_v28 }
  0xfb   :  { %556 = dma.vmem_to_hbm [thread:$0]  %s552_s18, 16, %s554_s20, [#allocation4]  }
  0xfc   :  { %545 = vst [vmem:[#allocation5] sm:$0x1] %v544_v27 }
  0xfd   :  { %567 = dma.vmem_to_hbm [thread:$0]  %s563_s22, 16, %s565_s25, [#allocation6]  }
  0xfe   :  { %727 = dma.done.wait [#allocation4], 16  }
  0xff   :  { %728 = vsyncadd [#allocation4], 4294967280 }
 0x100   :  { %729 = dma.done.wait [#allocation6], 16  }
 0x101   :  { %730 = vsyncadd [#allocation6], 4294967280 }
 0x102   :  { %576 = vsyncpa [#allocation4], 1 }
 0x103   :  { %577 = vsyncpa [#allocation6], 1 }

</bundles_post_ra>
